<compile_context>
chip_gen: v7x
topology: tpu7x:2x2x1
jax: 0.10.0
libtpu: 0.0.40
codegen_flags: <defaults>
</compile_context>

<pallas_src>
import jax
import jax.numpy as jnp
from jax.experimental import pallas as pl
from jax.experimental.pallas import tpu as pltpu


def _ln_linear_kernel(x_ref, p_ref, c_ref, o_ref):
    # x_ref: (R, D)   rows of the flattened (B*T, D) input, native dtype
    # p_ref: (8, D)   packed params (x dtype): row0 = gamma*w - mean(gamma*w),
    #                 row1 = ones
    # c_ref: (1, 1)   SMEM scalar: dot(beta, w) + bias
    # o_ref: (1, R)   lane-dense logits for this tile
    x = x_ref[...]
    p = p_ref[...]
    d = x.shape[1]

    # Contract over D of both operands: P @ X^T -> stats with rows on lanes.
    # x stays in its native dtype on the MXU; accumulation is f32.
    contract = (((1,), (1,)), ((), ()))
    m1 = jax.lax.dot_general(p, x, contract,
                             preferred_element_type=jnp.float32)      # (8, R)
    m2 = jax.lax.dot_general(p, x * x, contract,
                             preferred_element_type=jnp.float32)      # (8, R)

    s_gw = m1[0:1, :]   # sum_d x * (gamma*w - mean(gamma*w)) == sum_d (x-mean)*gamma*w
    s_x = m1[1:2, :]    # sum_d x
    s_x2 = m2[1:2, :]   # sum_d x^2

    inv_d = 1.0 / d
    mean = s_x * inv_d
    # E[x^2] - E[x]^2 (slightly cancellation-prone for |mean| >> std, fine for
    # normalized activations; torch eps=1e-5 below matches nn.LayerNorm default).
    var = s_x2 * inv_d - mean * mean
    inv = jax.lax.rsqrt(var + 1e-5)

    o_ref[...] = (inv * s_gw + c_ref[0, 0]).astype(o_ref.dtype)


def _round_up(n, m):
    return ((n + m - 1) // m) * m


def _vmem_capacity_bytes():
    # Trace-time hardware query; conservative (v7x-class) fallback if the
    # query is unavailable in this environment.
    try:
        return int(pltpu.get_tpu_info().vmem_capacity_bytes)
    except Exception:
        return 64 * 1024 * 1024


def _vmem_limit_bytes():
    if _vmem_capacity_bytes() >= 128 * 1024 * 1024:   # v5e / v6e
        return 64 * 1024 * 1024
    return 32 * 1024 * 1024                           # v7x-class (64 MiB physical)


def _choose_row_tile(rows, d, itemsize):
    # Generation-gated budget for the streaming x tile.
    if _vmem_capacity_bytes() >= 128 * 1024 * 1024:
        budget = 24 * 1024 * 1024      # v5e / v6e: 128 MiB VMEM, go big
    else:
        budget = 10 * 1024 * 1024      # v7x: 64 MiB physical, stay conservative
    # Live bytes per row: double-buffered input (2 * itemsize * D) + the x*x
    # temporary (itemsize * D) + generous slack (4 * D) for f32 stats /
    # pipeline internals.  No full-tile f32 up-cast copy anymore.
    per_row = d * (3 * itemsize + 4)
    rt = budget // per_row
    rt = max(128, min(2048, (rt // 128) * 128))
    # Do not blow tiny inputs up to the cap.
    rt = min(rt, _round_up(rows, 128))
    # Keep >= 2 grid steps once there is enough work, so ("parallel",) can
    # shard the row axis across both v7x TensorCores.
    if rows >= 256:
        rt = min(rt, _round_up(rows, 256) // 2)
    return int(rt)


def segmentation_frame_classifier(x, attention_mask, gamma, beta, w, b):
    """x: (B, T, D), attention_mask: (B, T) (unused here, kept for parity).
    gamma/beta: (D,) LayerNorm params; w: (1, D), b: (1,) classifier params.
    Returns logits of shape (B, T)."""
    del attention_mask  # only consumed by the (absent) transformer branch
    B, T, D = x.shape
    rows = B * T

    # Fold LayerNorm affine + classification layer into one D-vector + scalar.
    w_vec = w.reshape(D).astype(jnp.float32)
    gw = gamma.astype(jnp.float32) * w_vec
    gwp = gw - jnp.mean(gw)                                   # handles the -mean term
    c = jnp.dot(beta.astype(jnp.float32), w_vec) + b.reshape(()).astype(jnp.float32)
    p = jnp.zeros((8, D), jnp.float32).at[0].set(gwp).at[1].set(1.0)
    p = p.astype(x.dtype)            # keep the MXU on x's native dtype path
    c_arr = c.reshape(1, 1)

    x_flat = x.reshape(rows, D)
    itemsize = jnp.dtype(x_flat.dtype).itemsize
    row_tile = _choose_row_tile(rows, D, itemsize)

    num_tiles = pl.cdiv(rows, row_tile)
    out_cols = num_tiles * row_tile   # tiny padded output; input is NOT padded

    cost = pl.CostEstimate(
        flops=4 * rows * D,
        transcendentals=rows,
        bytes_accessed=rows * D * itemsize + out_cols * itemsize + 8 * D * itemsize,
    )

    out = pl.pallas_call(
        _ln_linear_kernel,
        out_shape=jax.ShapeDtypeStruct((1, out_cols), x.dtype),
        grid_spec=pltpu.PrefetchScalarGridSpec(
            num_scalar_prefetch=0,
            grid=(num_tiles,),
            in_specs=[
                pl.BlockSpec((row_tile, D), lambda i: (i, 0)),
                pl.BlockSpec((8, D), lambda i: (0, 0)),
                pl.BlockSpec(memory_space=pltpu.MemorySpace.SMEM),
            ],
            out_specs=pl.BlockSpec((1, row_tile), lambda i: (0, i)),
        ),
        compiler_params=pltpu.CompilerParams(
            dimension_semantics=("parallel",),
            vmem_limit_bytes=_vmem_limit_bytes(),
        ),
        cost_estimate=cost,
    )(x_flat, p, c_arr)

    return out[0, :rows].reshape(B, T)


def _reference(x, gamma, beta, w, b):
    mean = jnp.mean(x, axis=-1, keepdims=True)
    var = jnp.mean((x - mean) ** 2, axis=-1, keepdims=True)
    xn = (x - mean) / jnp.sqrt(var + 1e-5) * gamma + beta
    return (xn @ w.reshape(1, -1).T + b).squeeze(-1)


if __name__ == "__main__":
    B, T, D = 2, 8, 32  # batch=2, seq=8, d_model=32

    key = jax.random.PRNGKey(0)
    kx, kg, kb, kw, kbias = jax.random.split(key, 5)

    x = jax.random.normal(kx, (B, T, D), dtype=jnp.float32)
    attention_mask = jnp.ones((B, T), dtype=jnp.int32)  # 1 = valid frame

    # Deterministic synthetic parameters (shapes match the PyTorch module).
    gamma = 1.0 + 0.05 * jax.random.normal(kg, (D,), dtype=jnp.float32)
    beta = 0.05 * jax.random.normal(kb, (D,), dtype=jnp.float32)
    w = jax.random.normal(kw, (1, D), dtype=jnp.float32) / jnp.sqrt(D)
    b = 0.1 * jax.random.normal(kbias, (1,), dtype=jnp.float32)

    logits = segmentation_frame_classifier(x, attention_mask, gamma, beta, w, b)
    logits = jax.block_until_ready(logits)

    ref = _reference(x, gamma, beta, w, b)
    assert logits.shape == (B, T)
    assert jnp.allclose(logits, ref, atol=1e-4, rtol=1e-4)

    print("KERNEL_OK")
</pallas_src>

<mosaic_0001>
module attributes {stable_mosaic.version = 11 : i64} {
  func.func @_ln_linear_kernel(%arg0: i32, %arg1: memref<128x32xf32, #tpu.memory_space<vmem>>, %arg2: memref<8x32xf32, #tpu.memory_space<vmem>>, %arg3: memref<1x1xf32, #tpu.memory_space<smem>>, %arg4: memref<1x128xf32, #tpu.memory_space<vmem>>) attributes {dimension_semantics = [#tpu.dimension_semantics<parallel>], iteration_bounds = array<i64: 1>, scalar_prefetch = 0 : i64, scratch_operands = 0 : i64, tpu.core_type = #tpu.core_type<tc>, window_params = [{transform_indices = @transform_0, window_bounds = array<i64: 128, 32>}, {pipeline_mode = #tpu.pipeline_mode<synchronous>, transform_indices = @transform_1, window_bounds = array<i64: 8, 32>}, {transform_indices = @transform_2, window_bounds = array<i64: 1, 1>}, {transform_indices = @transform_3, window_bounds = array<i64: 1, 128>}]} {
    %c0 = arith.constant 0 : index
    %c0_0 = arith.constant 0 : index
    %0 = vector.load %arg1[%c0, %c0_0] : memref<128x32xf32, #tpu.memory_space<vmem>>, vector<128x32xf32>
    %c0_1 = arith.constant 0 : index
    %c0_2 = arith.constant 0 : index
    %1 = vector.load %arg2[%c0_1, %c0_2] : memref<8x32xf32, #tpu.memory_space<vmem>>, vector<8x32xf32>
    %cst = arith.constant dense<0.000000e+00> : vector<8x128xf32>
    %2 = tpu.matmul %1, %0, %cst {dimension_numbers = #tpu.dot_dimension_numbers<[1], [1], [0], [0], [0, 0, 1, 0], [], []>} : vector<8x32xf32>, vector<128x32xf32>, vector<8x128xf32> -> vector<8x128xf32>
    %3 = arith.mulf %0, %0 : vector<128x32xf32>
    %cst_3 = arith.constant dense<0.000000e+00> : vector<8x128xf32>
    %4 = tpu.matmul %1, %3, %cst_3 {dimension_numbers = #tpu.dot_dimension_numbers<[1], [1], [0], [0], [0, 0, 1, 0], [], []>} : vector<8x32xf32>, vector<128x32xf32>, vector<8x128xf32> -> vector<8x128xf32>
    %5 = vector.extract_strided_slice %2 {offsets = [0, 0], sizes = [1, 128], strides = [1, 1]} : vector<8x128xf32> to vector<1x128xf32>
    %6 = vector.extract_strided_slice %2 {offsets = [1, 0], sizes = [1, 128], strides = [1, 1]} : vector<8x128xf32> to vector<1x128xf32>
    %7 = vector.extract_strided_slice %4 {offsets = [1, 0], sizes = [1, 128], strides = [1, 1]} : vector<8x128xf32> to vector<1x128xf32>
    %cst_4 = arith.constant 3.125000e-02 : f32
    %8 = vector.broadcast %cst_4 : f32 to vector<1x128xf32>
    %9 = arith.mulf %6, %8 : vector<1x128xf32>
    %cst_5 = arith.constant 3.125000e-02 : f32
    %10 = vector.broadcast %cst_5 : f32 to vector<1x128xf32>
    %11 = arith.mulf %7, %10 : vector<1x128xf32>
    %12 = arith.mulf %9, %9 : vector<1x128xf32>
    %13 = arith.subf %11, %12 : vector<1x128xf32>
    %cst_6 = arith.constant 9.99999974E-6 : f32
    %14 = vector.broadcast %cst_6 : f32 to vector<1x128xf32>
    %15 = arith.addf %13, %14 : vector<1x128xf32>
    %16 = math.rsqrt %15 : vector<1x128xf32>
    %17 = arith.mulf %16, %5 : vector<1x128xf32>
    %c0_7 = arith.constant 0 : index
    %c0_8 = arith.constant 0 : index
    %18 = memref.load %arg3[%c0_7, %c0_8] : memref<1x1xf32, #tpu.memory_space<smem>>
    %19 = vector.broadcast %18 : f32 to vector<1x128xf32>
    %20 = arith.addf %17, %19 : vector<1x128xf32>
    %c0_9 = arith.constant 0 : index
    %c0_10 = arith.constant 0 : index
    %21 = vector.load %arg4[%c0_9, %c0_10] : memref<1x128xf32, #tpu.memory_space<vmem>>, vector<1x128xf32>
    tpu.vector_store %arg4[%c0_9, %c0_10], %20 {strides = array<i32>} : memref<1x128xf32, #tpu.memory_space<vmem>>, vector<1x128xf32>,
    return
  }
  func.func @transform_0(%arg0: i32) -> (i32, i32) {
    %c0_i32 = arith.constant 0 : i32
    %c0_i32_0 = arith.constant 0 : i32
    return %arg0, %c0_i32 : i32, i32
  }
  func.func @transform_1(%arg0: i32) -> (i32, i32) {
    %c0_i32 = arith.constant 0 : i32
    %c0_i32_0 = arith.constant 0 : i32
    %c0_i32_1 = arith.constant 0 : i32
    return %c0_i32, %c0_i32_0 : i32, i32
  }
  func.func @transform_2(%arg0: i32) -> (i32, i32) {
    %c0_i32 = arith.constant 0 : i32
    %c0_i32_0 = arith.constant 0 : i32
    %c0_i32_1 = arith.constant 0 : i32
    return %c0_i32, %c0_i32_0 : i32, i32
  }
  func.func @transform_3(%arg0: i32) -> (i32, i32) {
    %c0_i32 = arith.constant 0 : i32
    %c0_i32_0 = arith.constant 0 : i32
    return %c0_i32, %arg0 : i32, i32
  }
}

</mosaic_0001>

<bundles_post_ra>
// kernel: tpu_custom_call.1
= control target key start
LH: loop header
LB: loop body
LE: loop exit
PB: predicated region body
PF: predicated region fallthrough
CT: control target
= control target key end

     0   :  { %9 = vsyncpa [#allocation4], 0  ;;  %s752_s0 = inlined_call_operand.hbm [shape: f32[16,32], index: 0, kind: input, shape index: {}]   ;;  %s753_s1 = inlined_call_operand.hbm [shape: f32[8,32], index: 1, kind: input, shape index: {}]   ;;  %s754_s2 = inlined_call_operand.<no memory space> [shape: f32[1,1], index: 2, kind: input, shape index: {}]   ;;  %s755_s3 = inlined_call_operand.hbm [shape: f32[1,128], index: 3, kind: output, shape index: {}]  }
   0x1   :  { %10 = vsyncpa [#allocation7], 0 }
   0x2   :  { %11 = vsyncpa [#allocation5], 0 }
   0x3   :  { %16 = vsyncadd [#allocation4], 1792  ;;  %s629_s12 = smov [#allocation3]   ;;  %s557_s16 = scalar_lea.hbm %s752_s0, 256 }
   0x4   :  { %s17_s13 = sshll.u32 %s629_s12, 4  ;;  %p558_p0 = scmp.ne.s32.totalorder %s752_s0, %s557_s16  ;;  %s18_s13 = int_to_ptr.vmem [resolvable:$true] %s17_s13 }
   0x5   :  { %p561_p1 = scmp.lt.u32.totalorder %s557_s16, %s752_s0 }
   0x7   :  { %p563_p2 = pnand %p561_p1, %p558_p0 }
   0x9   :  { %566 = shalt.err (!%p563_p2)
}
   0xa   :  { %s567_s21 = scalar_lea.vmem %s18_s13, 256  ;;  %s571_s22 = scalar_lea.vmem %s18_s13, 2048 }
   0xb   :  { %p568_p3 = scmp.ne.s32.totalorder %s18_s13, %s567_s21  ;;  %p572_p4 = scmp.lt.s32.totalorder %s18_s13, %s18_s13 }
   0xc   :  { %p573_p5 = scmp.lt.s32.totalorder %s571_s22, %s567_s21 }
   0xe   :  { %p574_p6 = por %p573_p5, %p572_p4 }
  0x10   :  { %p575_p7 = pnand %p574_p6, %p568_p3 }
  0x12   :  { %578 = shalt.err (!%p575_p7)
}
  0x13   :  { %s630_s23 = smov 128   ;;  %s631_s24 = smov 8  }
  0x14   :  { %23 = dma.hbm_to_vmem [thread:$0]  %s752_s0, 256, %s18_s13, [#allocation4], %s630_s23, %s630_s23, %s631_s24  }
  0x15   :  { %s632_s27 = smov [#allocation6]   ;;  %s579_s4 = scalar_lea.hbm %s753_s1, 128 }
  0x16   :  { %s30_s28 = sshll.u32 %s632_s27, 4  ;;  %p580_p8 = scmp.ne.s32.totalorder %s753_s1, %s579_s4  ;;  %s31_s28 = int_to_ptr.vmem [resolvable:$true] %s30_s28 }
  0x17   :  { %p583_p9 = scmp.lt.u32.totalorder %s579_s4, %s753_s1 }
  0x19   :  { %p585_p10 = pnand %p583_p9, %p580_p8 }
  0x1b   :  { %588 = shalt.err (!%p585_p10)
}
  0x1c   :  { %s589_s9 = scalar_lea.vmem %s31_s28, 128  ;;  %p594_p12 = scmp.lt.s32.totalorder %s31_s28, %s31_s28 }
  0x1d   :  { %p590_p11 = scmp.ne.s32.totalorder %s31_s28, %s589_s9  ;;  %p595_p13 = scmp.lt.s32.totalorder %s589_s9, %s589_s9 }
  0x1f   :  { %p596_p0 = por %p595_p13, %p594_p12 }
  0x21   :  { %p597_p1 = pnand %p596_p0, %p590_p11 }
  0x23   :  { %600 = shalt.err (!%p597_p1)
}
  0x24   :  { %33 = dma.hbm_to_vmem [thread:$0]  %s753_s1, 128, %s31_s28, [#allocation7]  }
  0x25   :  { %623 = dma.done.wait [#allocation4], 2048  }
  0x26   :  { %624 = vsyncadd [#allocation4], 4294965248 }
  0x27   :  { %625 = dma.done.wait [#allocation7], 128  }
  0x28   :  { %626 = vsyncadd [#allocation7], 4294967168  ;;  %v633_v0 = vmov 0.0|0.0   ;;  %vm634_vm0 = vmmov 0   ;;  %v635_v1 = vmov 0.0   ;;  %vm59_vm1 = vcmask 261120  }
  0x29   :  { %483 = vmatprep.subr.bf16.mxu0 %v633_v0  ;;  %515 = vmatprep.subr.bf16.mxu1 %v633_v0  ;;  %v42_v2 = vld [vmem:[#allocation3] sm:$0xff]  ;;  %v43_v3 = vld [vmem:[#allocation3 + $0x8] sm:$0xff]  ;;  %vm685_vm2 = vmpackc.low %vm59_vm1, %vm59_vm1  ;;  %v326_v63 = vstv %s754_s2  ;;  %s636_s12 = smov [#allocation8]  }
  0x2a   :  { %445 = vmatprep.mubr.msk.f32.mxu0 %vm634_vm0, %v635_v1  ;;  %480 = vmatprep.mubr.msk.f32.mxu1 %vm634_vm0, %v635_v1  ;;  %v484_v5 = vpack.c.bf16 %v43_v3, %v42_v2  ;;  %v181_v6 = vmul.f32 %v42_v2, %v42_v2  ;;  %v182_v7 = vmul.f32 %v43_v3, %v43_v3  ;;  %v44_v8 = vld [vmem:[#allocation3 + $0x10] sm:$0xff]  ;;  %v45_v9 = vld [vmem:[#allocation3 + $0x18] sm:$0xff]  ;;  %v46_v15 = vld [vmem:[#allocation3 + $0x20] sm:$0xff]  ;;  %s335_s13 = sshll.u32 %s636_s12, 4  ;;  %s336_s13 = int_to_ptr.vmem [resolvable:$true] %s335_s13 }
  0x2b   :  { %v183_v11 = vmul.f32 %v44_v8, %v44_v8  ;;  %v184_v12 = vmul.f32 %v45_v9, %v45_v9  ;;  %v488_v13 = vpack.c.bf16 %v45_v9, %v44_v8  ;;  %v47_v16 = vld [vmem:[#allocation3 + $0x28] sm:$0xff]  ;;  %v185_v17 = vmul.f32 %v46_v15, %v46_v15  ;;  %v48_v21 = vld [vmem:[#allocation3 + $0x30] sm:$0xff]  ;;  %v49_v22 = vld [vmem:[#allocation3 + $0x38] sm:$0xff]  ;;  %s601_s14 = scalar_lea.vmem %s336_s13, 16  ;;  %s605_s15 = scalar_lea.vmem %s336_s13, 32 }
  0x2c   :  { %486 = vmatpush3.bf16.xpose.msk.msra.mxu0 %vm685_vm2, %v484_v5  ;;  %v516_v10 = vpack.c.bf16 %v182_v7, %v181_v6  ;;  %v186_v18 = vmul.f32 %v47_v16, %v47_v16  ;;  %v492_v19 = vpack.c.bf16 %v47_v16, %v46_v15  ;;  %v187_v23 = vmul.f32 %v48_v21, %v48_v21  ;;  %v50_v27 = vld [vmem:[#allocation3 + $0x40] sm:$0xff]  ;;  %v51_v28 = vld [vmem:[#allocation3 + $0x48] sm:$0xff]  ;;  %v52_v33 = vld [vmem:[#allocation3 + $0x50] sm:$0xff]  ;;  %p602_p2 = scmp.ne.s32.totalorder %s336_s13, %s601_s14  ;;  %p606_p3 = scmp.lt.s32.totalorder %s336_s13, %s336_s13 }
  0x2d   :  { %487 = vmatprep.subr.bf16.mxu0 %v633_v0  ;;  %v520_v14 = vpack.c.bf16 %v184_v12, %v183_v11  ;;  %v188_v24 = vmul.f32 %v49_v22, %v49_v22  ;;  %v496_v25 = vpack.c.bf16 %v49_v22, %v48_v21  ;;  %v189_v29 = vmul.f32 %v50_v27, %v50_v27  ;;  %v53_v34 = vld [vmem:[#allocation3 + $0x58] sm:$0xff]  ;;  %v54_v39 = vld [vmem:[#allocation3 + $0x60] sm:$0xff]  ;;  %v55_v40 = vld [vmem:[#allocation3 + $0x68] sm:$0xff]  ;;  %p607_p4 = scmp.lt.s32.totalorder %s605_s15, %s601_s14 }
  0x2e   :  { %518 = vmatpush3.bf16.xpose.msk.msra.mxu1 %vm685_vm2, %v516_v10  ;;  %v524_v20 = vpack.c.bf16 %v186_v18, %v185_v17  ;;  %v190_v30 = vmul.f32 %v51_v28, %v51_v28  ;;  %v500_v31 = vpack.c.bf16 %v51_v28, %v50_v27  ;;  %v191_v35 = vmul.f32 %v52_v33, %v52_v33  ;;  %v56_v45 = vld [vmem:[#allocation3 + $0x70] sm:$0xff]  ;;  %v57_v46 = vld [vmem:[#allocation3 + $0x78] sm:$0xff]  ;;  %v58_v51 = vld [vmem:[#allocation6] sm:$0xff] }
  0x2f   :  { %519 = vmatprep.subr.bf16.mxu1 %v633_v0  ;;  %v528_v26 = vpack.c.bf16 %v188_v24, %v187_v23  ;;  %v192_v36 = vmul.f32 %v53_v34, %v53_v34  ;;  %v504_v37 = vpack.c.bf16 %v53_v34, %v52_v33  ;;  %v193_v41 = vmul.f32 %v54_v39, %v54_v39  ;;  %p608_p5 = por %p607_p4, %p606_p3 }
  0x30   :  { %v532_v32 = vpack.c.bf16 %v190_v30, %v189_v29  ;;  %v194_v42 = vmul.f32 %v55_v40, %v55_v40  ;;  %v508_v43 = vpack.c.bf16 %v55_v40, %v54_v39  ;;  %v195_v47 = vmul.f32 %v56_v45, %v56_v45 }
  0x31   :  { %v536_v38 = vpack.c.bf16 %v192_v36, %v191_v35  ;;  %v196_v48 = vmul.f32 %v57_v46, %v57_v46  ;;  %v512_v49 = vpack.c.bf16 %v57_v46, %v56_v45  ;;  %p609_p6 = pnand %p608_p5, %p602_p2 }
  0x32   :  { %v540_v44 = vpack.c.bf16 %v194_v42, %v193_v41 }
  0x33   :  { %v544_v50 = vpack.c.bf16 %v196_v48, %v195_v47 }
  0x34   :  { %490 = vmatpush3.bf16.xpose.msk.msra.mxu0 %vm685_vm2, %v488_v13 }
  0x35   :  { %491 = vmatprep.subr.bf16.mxu0 %v633_v0 }
  0x36   :  { %522 = vmatpush3.bf16.xpose.msk.msra.mxu1 %vm685_vm2, %v520_v14 }
  0x37   :  { %523 = vmatprep.subr.bf16.mxu1 %v633_v0 }
  0x3c   :  { %494 = vmatpush3.bf16.xpose.msk.msra.mxu0 %vm685_vm2, %v492_v19 }
  0x3d   :  { %495 = vmatprep.subr.bf16.mxu0 %v633_v0 }
  0x3e   :  { %526 = vmatpush3.bf16.xpose.msk.msra.mxu1 %vm685_vm2, %v524_v20 }
  0x3f   :  { %527 = vmatprep.subr.bf16.mxu1 %v633_v0 }
  0x44   :  { %498 = vmatpush3.bf16.xpose.msk.msra.mxu0 %vm685_vm2, %v496_v25 }
  0x45   :  { %499 = vmatprep.subr.bf16.mxu0 %v633_v0 }
  0x46   :  { %530 = vmatpush3.bf16.xpose.msk.msra.mxu1 %vm685_vm2, %v528_v26 }
  0x47   :  { %531 = vmatprep.subr.bf16.mxu1 %v633_v0 }
  0x4c   :  { %502 = vmatpush3.bf16.xpose.msk.msra.mxu0 %vm685_vm2, %v500_v31 }
  0x4d   :  { %503 = vmatprep.subr.bf16.mxu0 %v633_v0 }
  0x4e   :  { %534 = vmatpush3.bf16.xpose.msk.msra.mxu1 %vm685_vm2, %v532_v32 }
  0x4f   :  { %535 = vmatprep.subr.bf16.mxu1 %v633_v0 }
  0x54   :  { %506 = vmatpush3.bf16.xpose.msk.msra.mxu0 %vm685_vm2, %v504_v37 }
  0x55   :  { %507 = vmatprep.subr.bf16.mxu0 %v633_v0 }
  0x56   :  { %538 = vmatpush3.bf16.xpose.msk.msra.mxu1 %vm685_vm2, %v536_v38 }
  0x57   :  { %539 = vmatprep.subr.bf16.mxu1 %v633_v0 }
  0x5c   :  { %510 = vmatpush3.bf16.xpose.msk.msra.mxu0 %vm685_vm2, %v508_v43 }
  0x5d   :  { %511 = vmatprep.subr.bf16.mxu0 %v633_v0 }
  0x5e   :  { %542 = vmatpush3.bf16.xpose.msk.msra.mxu1 %vm685_vm2, %v540_v44 }
  0x5f   :  { %543 = vmatprep.subr.bf16.mxu1 %v633_v0 }
  0x64   :  { %514 = vmatpush3.bf16.xpose.msk.msra.mxu0 %vm685_vm2, %v512_v49 }
  0x66   :  { %546 = vmatpush3.bf16.xpose.msk.msra.mxu1 %vm685_vm2, %v544_v50 }
  0x6b   :  { %446 = vmatmul.mubr.msk.f32.vlgmr.msra.gmra.mrb[0].mxu0 %vm59_vm1, %v58_v51 }
  0x6d   :  { %481 = vmatmul.mubr.msk.f32.vlgmr.msra.gmra.mrb[0].mxu1 %vm59_vm1, %v58_v51 }
 0x13e   :  { %v177_v52 = vpop.f32.mrb[0].mxu0 }
 0x13f   :  { %v315_v53 = vmul.f32 0.03125, %v177_v52  ;;  %v447_v54 = vpop.f32.mrb[1].mxu0  ;;  %v322_v61 = vrot.slane %v177_v52, 7 }
 0x140   :  { %v311_v55 = vpop.f32.mrb[0].mxu1 }
 0x141   :  { %v317_v56 = vmul.f32 %v315_v53, %v315_v53  ;;  %v316_v57 = vmul.f32 0.03125, %v311_v55  ;;  %v482_v58 = vpop.f32.mrb[1].mxu1 }
 0x143   :  { %v318_v59 = vsub.f32 %v316_v57, %v317_v56 }
 0x145   :  { %v319_v60 = vadd.f32 1e-05, %v318_v59 }
 0x147   :  { %555 = vrsqrt.f32 %v319_v60 }
 0x151   :  { %v556_v62 = vpop.eup %555 }
 0x152   :  { %v324_v0 = vmul.f32 %v556_v62, %v322_v61 }
 0x154   :  { %v327_v1 = vadd.f32 %v326_v63, %v324_v0 }
 0x156   :  { %328 = vst [vmem:[#allocation8 - $0x1] sm:$0x2] %v327_v1 }
 0x157   :  { %612 = shalt.err (!%p609_p6)
}
 0x158   :  { %s613_s18 = scalar_lea.hbm %s755_s3, 16 }
 0x159   :  { %p614_p7 = scmp.ne.s32.totalorder %s755_s3, %s613_s18  ;;  %p617_p8 = scmp.lt.u32.totalorder %s613_s18, %s755_s3 }
 0x15b   :  { %p619_p9 = pnand %p617_p8, %p614_p7 }
 0x15d   :  { %622 = shalt.err (!%p619_p9)
}
 0x15e   :  { %338 = dma.vmem_to_hbm [thread:$0]  %s336_s13, 16, %s755_s3, [#allocation5]  }
 0x15f   :  { %627 = dma.done.wait [#allocation5], 16  }
 0x160   :  { %628 = vsyncadd [#allocation5], 4294967280 }
 0x161   :  { %342 = vsyncpa [#allocation4], 1 }
 0x162   :  { %343 = vsyncpa [#allocation7], 1 }
 0x163   :  { %344 = vsyncpa [#allocation5], 1 }

</bundles_post_ra>
